<compile_context>
chip_gen: v7x
topology: tpu7x:2x2x1
jax: 0.10.0
libtpu: 0.0.40
codegen_flags: <defaults>
</compile_context>

<pallas_src>
import functools

import jax
import jax.numpy as jnp
from jax import lax
from jax.experimental import pallas as pl
from jax.experimental.pallas import tpu as pltpu


# ---------------------------------------------------------------------------
# Prologue: Q/K/V projection (one pass over x; hoisted out of the kv loop).
# ---------------------------------------------------------------------------
def _proj_kernel(x_ref, wq_ref, wk_ref, wv_ref, q_ref, k_ref, v_ref):
    x = x_ref[0]                                                     # (tp, C)
    q_ref[0] = jnp.dot(x, wq_ref[...],
                       preferred_element_type=jnp.float32).astype(q_ref.dtype)
    k_ref[0] = jnp.dot(x, wk_ref[...],
                       preferred_element_type=jnp.float32).astype(k_ref.dtype)
    v_ref[0] = jnp.dot(x, wv_ref[...],
                       preferred_element_type=jnp.float32).astype(v_ref.dtype)


def _project_qkv(x, wq, wk, wv, *, tile):
    B, T, C = x.shape
    H = wq.shape[1]
    out_sds = jax.ShapeDtypeStruct((B, T, H), x.dtype)
    w_spec = pl.BlockSpec((C, H), lambda b, i: (0, 0))
    qkv_spec = pl.BlockSpec((1, tile, H), lambda b, i: (b, i, 0))
    return pl.pallas_call(
        _proj_kernel,
        out_shape=(out_sds, out_sds, out_sds),
        grid_spec=pltpu.PrefetchScalarGridSpec(
            num_scalar_prefetch=0,
            grid=(B, T // tile),
            in_specs=[
                pl.BlockSpec((1, tile, C), lambda b, i: (b, i, 0)),   # x tile
                w_spec, w_spec, w_spec,                               # wq, wk, wv
            ],
            out_specs=[qkv_spec, qkv_spec, qkv_spec],
        ),
        compiler_params=pltpu.CompilerParams(
            dimension_semantics=("parallel", "parallel")),
    )(x, wq, wk, wv)


# ---------------------------------------------------------------------------
# Flash-attention pass over precomputed Q/K/V (online softmax).
# ---------------------------------------------------------------------------
def _flash_kernel(q_ref, k_ref, v_ref, o_ref, m_sc, l_sc, acc_sc, *, tq, tk):
    qi = pl.program_id(1)
    ki = pl.program_id(2)

    @pl.when(ki == 0)
    def _init():
        m_sc[...] = jnp.full_like(m_sc, -jnp.inf)
        l_sc[...] = jnp.zeros_like(l_sc)
        acc_sc[...] = jnp.zeros_like(acc_sc)

    q_first_row = qi * tq
    q_last_row = q_first_row + (tq - 1)
    kv_first_col = ki * tk
    kv_last_col = kv_first_col + (tk - 1)

    # Only tiles with at least one unmasked (row >= col) entry contribute.
    @pl.when(kv_first_col <= q_last_row)
    def _compute():
        q = q_ref[0]                                   # (tq, H), pre-scaled
        k = k_ref[0]                                   # (tk, H)
        v = v_ref[0]                                   # (tk, H)
        # Contract the head dim directly: keeps k in its natural (tk, H) layout.
        s = lax.dot_general(q, k, dimension_numbers=(((1,), (1,)), ((), ())),
                            preferred_element_type=jnp.float32)       # (tq, tk)

        def _update(s_val):
            m_prev = m_sc[...]
            m_new = jnp.maximum(m_prev, jnp.max(s_val, axis=-1, keepdims=True))
            alpha = jnp.exp(m_prev - m_new)
            p = jnp.exp(s_val - m_new)
            l_sc[...] = alpha * l_sc[...] + jnp.sum(p, axis=-1, keepdims=True)
            acc_sc[...] = alpha * acc_sc[...] + jnp.dot(
                p.astype(v.dtype), v, preferred_element_type=jnp.float32)
            m_sc[...] = m_new

        @pl.when(kv_last_col <= q_first_row)           # fully below the diagonal
        def _no_mask():
            _update(s)                                 # fast path: no mask work

        @pl.when(kv_last_col > q_first_row)            # straddles the diagonal
        def _with_mask():
            row = q_first_row + lax.broadcasted_iota(jnp.int32, (tq, tk), 0)
            col = kv_first_col + lax.broadcasted_iota(jnp.int32, (tq, tk), 1)
            _update(jnp.where(row >= col, s, -jnp.inf))

    @pl.when(ki == pl.num_programs(2) - 1)
    def _finalize():
        # TODO(synk): training-mode dropout on the attention weights would need
        # pltpu.prng_seed + pltpu.stateful_bernoulli; nn.Dropout in eval == identity.
        inv_l = pl.reciprocal(l_sc[...], approx=False)   # exact; runs once per q tile
        o_ref[0] = (acc_sc[...] * inv_l).astype(o_ref.dtype)


def _flash_attention(q, k, v, *, tq, tk, out_dtype):
    B, T, H = q.shape
    nq, nk = T // tq, T // tk

    def q_map(b, qi, ki):
        return (b, qi, 0)

    def kv_map(b, qi, ki):
        # Clamp the kv block index at the causal boundary: for fully-masked kv
        # tiles the block index does not advance, so Pallas skips their DMA.
        kmax = (qi * tq + tq - 1) // tk
        return (b, jnp.minimum(ki, kmax), 0)

    kernel = functools.partial(_flash_kernel, tq=tq, tk=tk)

    itemsize = jnp.dtype(q.dtype).itemsize
    qkv_bytes = B * T * H * itemsize
    cost = pl.CostEstimate(
        # (q@k^T + p@v) with causal halving: 2 * (2*B*T*T*H) / 2.
        flops=2 * B * T * T * H,
        transcendentals=B * T * T // 2,
        # q read once + out written once + K/V each restreamed ~nq/2 times.
        bytes_accessed=int(qkv_bytes * (2 + nq)),
    )

    return pl.pallas_call(
        kernel,
        out_shape=jax.ShapeDtypeStruct((B, T, H), out_dtype),
        grid_spec=pltpu.PrefetchScalarGridSpec(
            num_scalar_prefetch=0,
            grid=(B, nq, nk),
            in_specs=[
                pl.BlockSpec((1, tq, H), q_map),     # q (resident across kv axis)
                pl.BlockSpec((1, tk, H), kv_map),    # k stream (causal-clamped DMA)
                pl.BlockSpec((1, tk, H), kv_map),    # v stream (causal-clamped DMA)
            ],
            out_specs=pl.BlockSpec((1, tq, H), q_map),
            scratch_shapes=[
                pltpu.VMEM((tq, 1), jnp.float32),    # running max m
                pltpu.VMEM((tq, 1), jnp.float32),    # running denom l
                pltpu.VMEM((tq, H), jnp.float32),    # output accumulator
            ],
        ),
        compiler_params=pltpu.CompilerParams(
            dimension_semantics=("parallel", "parallel", "arbitrary")),
        cost_estimate=cost,
    )(q, k, v)


def _pick_tile(T, target=256):
    """Largest tile <= target that divides T (or whole T if it's small / awkward)."""
    if T <= target:
        return T
    for t in (512, 256, 128, 64, 32, 16, 8):
        if t <= target and T % t == 0:
            return t
    return T


def head_forward(x, wq, wk, wv, *, block_q=None, block_kv=None,
                 compute_dtype=jnp.bfloat16):
    """Single-head causal self-attention (eval mode), matching PyTorch `Head`.

    x: (B, T, C);  wq/wk/wv: (C, H) == nn.Linear.weight.T.  Returns (B, T, H).
    Matmuls run in `compute_dtype` (bf16 by default: MXU-native on v5e/v6e/v7x);
    softmax statistics and accumulation are always f32.
    NOTE: default tile 256 fills the 2x256^2 MXU on v6e/v7x; pass
    block_q=block_kv=128 on v5e (4x128^2 MXU).
    """
    B, T, C = x.shape
    H = wq.shape[1]
    tq = block_q or _pick_tile(T)
    tk = block_kv or _pick_tile(T)
    assert T % tq == 0 and T % tk == 0, "tile sizes must divide T"

    cdt = jnp.dtype(compute_dtype)
    scale = H ** -0.5
    x_c = x.astype(cdt)
    wq_c = (wq * scale).astype(cdt)   # fold 1/sqrt(H) into the q projection
    wk_c = wk.astype(cdt)
    wv_c = wv.astype(cdt)

    q, k, v = _project_qkv(x_c, wq_c, wk_c, wv_c, tile=_pick_tile(T))
    return _flash_attention(q, k, v, tq=tq, tk=tk, out_dtype=x.dtype)


def head_reference(x, wq, wk, wv):
    q = x @ wq
    k = x @ wk
    v = x @ wv
    s = (q @ jnp.swapaxes(k, -2, -1)) * (k.shape[-1] ** -0.5)
    T = x.shape[1]
    mask = jnp.tril(jnp.ones((T, T), dtype=bool))
    s = jnp.where(mask, s, -jnp.inf)
    wei = jax.nn.softmax(s, axis=-1)
    return wei @ v


if __name__ == "__main__":
    # 1) Small shapes consistent with the module (block_size = 8); f32 compute
    #    for exact parity with the PyTorch math.
    B, T, n_embd, head_size = 2, 8, 32, 16
    key = jax.random.PRNGKey(0)
    kx, kq, kk, kv = jax.random.split(key, 4)
    x = jax.random.normal(kx, (B, T, n_embd), dtype=jnp.float32)
    bound = 1.0 / (n_embd ** 0.5)
    wq = jax.random.uniform(kq, (n_embd, head_size), jnp.float32, -bound, bound)
    wk = jax.random.uniform(kk, (n_embd, head_size), jnp.float32, -bound, bound)
    wv = jax.random.uniform(kv, (n_embd, head_size), jnp.float32, -bound, bound)

    out = jax.block_until_ready(
        head_forward(x, wq, wk, wv, compute_dtype=jnp.float32))
    ref = head_reference(x, wq, wk, wv)
    assert out.shape == (B, T, head_size)
    assert jnp.allclose(out, ref, atol=2e-3, rtol=2e-3), \
        float(jnp.max(jnp.abs(out - ref)))

    # 2) Larger shape exercising the multi-tile flash path with default bf16
    #    compute and 256 tiles (grid = (2, 2, 2)): covers the fully-unmasked
    #    fast path, the diagonal masked path, and the clamped (skipped-DMA)
    #    fully-masked tiles.
    B2, T2, C2, H2 = 2, 512, 64, 32
    kx2, kq2, kk2, kv2 = jax.random.split(jax.random.PRNGKey(1), 4)
    x2 = jax.random.normal(kx2, (B2, T2, C2), dtype=jnp.float32)
    b2 = 1.0 / (C2 ** 0.5)
    wq2 = jax.random.uniform(kq2, (C2, H2), jnp.float32, -b2, b2)
    wk2 = jax.random.uniform(kk2, (C2, H2), jnp.float32, -b2, b2)
    wv2 = jax.random.uniform(kv2, (C2, H2), jnp.float32, -b2, b2)
    ref2 = head_reference(x2, wq2, wk2, wv2)

    out2 = jax.block_until_ready(head_forward(x2, wq2, wk2, wv2))
    assert jnp.allclose(out2, ref2, atol=2e-2, rtol=2e-2), \
        float(jnp.max(jnp.abs(out2 - ref2)))

    # Same data with 128 tiles (v5e-style config): more grid steps, more
    # clamped kv iterations; results must agree with the reference too.
    out3 = jax.block_until_ready(
        head_forward(x2, wq2, wk2, wv2, block_q=128, block_kv=128))
    assert jnp.allclose(out3, ref2, atol=2e-2, rtol=2e-2), \
        float(jnp.max(jnp.abs(out3 - ref2)))

    print("KERNEL_OK")
</pallas_src>

<mosaic_0001>
module attributes {stable_mosaic.version = 11 : i64} {
  func.func @_proj_kernel(%arg0: i32, %arg1: i32, %arg2: memref<1x8x32xf32, #tpu.memory_space<vmem>>, %arg3: memref<32x16xf32, #tpu.memory_space<vmem>>, %arg4: memref<32x16xf32, #tpu.memory_space<vmem>>, %arg5: memref<32x16xf32, #tpu.memory_space<vmem>>, %arg6: memref<1x8x16xf32, #tpu.memory_space<vmem>>, %arg7: memref<1x8x16xf32, #tpu.memory_space<vmem>>, %arg8: memref<1x8x16xf32, #tpu.memory_space<vmem>>) attributes {dimension_semantics = [#tpu.dimension_semantics<parallel>, #tpu.dimension_semantics<parallel>], iteration_bounds = array<i64: 2, 1>, scalar_prefetch = 0 : i64, scratch_operands = 0 : i64, tpu.core_type = #tpu.core_type<tc>, window_params = [{transform_indices = @transform_0, window_bounds = array<i64: 1, 8, 32>}, {pipeline_mode = #tpu.pipeline_mode<synchronous>, transform_indices = @transform_1, window_bounds = array<i64: 32, 16>}, {pipeline_mode = #tpu.pipeline_mode<synchronous>, transform_indices = @transform_2, window_bounds = array<i64: 32, 16>}, {pipeline_mode = #tpu.pipeline_mode<synchronous>, transform_indices = @transform_3, window_bounds = array<i64: 32, 16>}, {transform_indices = @transform_4, window_bounds = array<i64: 1, 8, 16>}, {transform_indices = @transform_5, window_bounds = array<i64: 1, 8, 16>}, {transform_indices = @transform_6, window_bounds = array<i64: 1, 8, 16>}]} {
    %c0 = arith.constant 0 : index
    %c0_0 = arith.constant 0 : index
    %c0_1 = arith.constant 0 : index
    %0 = vector.load %arg2[%c0, %c0_0, %c0_1] : memref<1x8x32xf32, #tpu.memory_space<vmem>>, vector<1x8x32xf32>
    %1 = vector.shape_cast %0 : vector<1x8x32xf32> to vector<8x32xf32>
    %c0_2 = arith.constant 0 : index
    %c0_3 = arith.constant 0 : index
    %2 = vector.load %arg3[%c0_2, %c0_3] : memref<32x16xf32, #tpu.memory_space<vmem>>, vector<32x16xf32>
    %cst = arith.constant dense<0.000000e+00> : vector<8x16xf32>
    %3 = tpu.matmul %1, %2, %cst {dimension_numbers = #tpu.dot_dimension_numbers<[1], [0], [0], [1], [0, 0, 1, 1], [], []>} : vector<8x32xf32>, vector<32x16xf32>, vector<8x16xf32> -> vector<8x16xf32>
    %c0_4 = arith.constant 0 : index
    %c0_5 = arith.constant 0 : index
    %c0_6 = arith.constant 0 : index
    %4 = vector.load %arg6[%c0_4, %c0_5, %c0_6] : memref<1x8x16xf32, #tpu.memory_space<vmem>>, vector<1x8x16xf32>
    %5 = vector.shape_cast %4 : vector<1x8x16xf32> to vector<8x16xf32>
    %6 = vector.shape_cast %3 : vector<8x16xf32> to vector<1x8x16xf32>
    tpu.vector_store %arg6[%c0_4, %c0_5, %c0_6], %6 {strides = array<i32>} : memref<1x8x16xf32, #tpu.memory_space<vmem>>, vector<1x8x16xf32>,
    %c0_7 = arith.constant 0 : index
    %c0_8 = arith.constant 0 : index
    %7 = vector.load %arg4[%c0_7, %c0_8] : memref<32x16xf32, #tpu.memory_space<vmem>>, vector<32x16xf32>
    %cst_9 = arith.constant dense<0.000000e+00> : vector<8x16xf32>
    %8 = tpu.matmul %1, %7, %cst_9 {dimension_numbers = #tpu.dot_dimension_numbers<[1], [0], [0], [1], [0, 0, 1, 1], [], []>} : vector<8x32xf32>, vector<32x16xf32>, vector<8x16xf32> -> vector<8x16xf32>
    %c0_10 = arith.constant 0 : index
    %c0_11 = arith.constant 0 : index
    %c0_12 = arith.constant 0 : index
    %9 = vector.load %arg7[%c0_10, %c0_11, %c0_12] : memref<1x8x16xf32, #tpu.memory_space<vmem>>, vector<1x8x16xf32>
    %10 = vector.shape_cast %9 : vector<1x8x16xf32> to vector<8x16xf32>
    %11 = vector.shape_cast %8 : vector<8x16xf32> to vector<1x8x16xf32>
    tpu.vector_store %arg7[%c0_10, %c0_11, %c0_12], %11 {strides = array<i32>} : memref<1x8x16xf32, #tpu.memory_space<vmem>>, vector<1x8x16xf32>,
    %c0_13 = arith.constant 0 : index
    %c0_14 = arith.constant 0 : index
    %12 = vector.load %arg5[%c0_13, %c0_14] : memref<32x16xf32, #tpu.memory_space<vmem>>, vector<32x16xf32>
    %cst_15 = arith.constant dense<0.000000e+00> : vector<8x16xf32>
    %13 = tpu.matmul %1, %12, %cst_15 {dimension_numbers = #tpu.dot_dimension_numbers<[1], [0], [0], [1], [0, 0, 1, 1], [], []>} : vector<8x32xf32>, vector<32x16xf32>, vector<8x16xf32> -> vector<8x16xf32>
    %c0_16 = arith.constant 0 : index
    %c0_17 = arith.constant 0 : index
    %c0_18 = arith.constant 0 : index
    %14 = vector.load %arg8[%c0_16, %c0_17, %c0_18] : memref<1x8x16xf32, #tpu.memory_space<vmem>>, vector<1x8x16xf32>
    %15 = vector.shape_cast %14 : vector<1x8x16xf32> to vector<8x16xf32>
    %16 = vector.shape_cast %13 : vector<8x16xf32> to vector<1x8x16xf32>
    tpu.vector_store %arg8[%c0_16, %c0_17, %c0_18], %16 {strides = array<i32>} : memref<1x8x16xf32, #tpu.memory_space<vmem>>, vector<1x8x16xf32>,
    return
  }
  func.func @transform_0(%arg0: i32, %arg1: i32) -> (i32, i32, i32) {
    %c0_i32 = arith.constant 0 : i32
    %c0_i32_0 = arith.constant 0 : i32
    return %arg0, %arg1, %c0_i32 : i32, i32, i32
  }
  func.func @transform_1(%arg0: i32, %arg1: i32) -> (i32, i32) {
    %c0_i32 = arith.constant 0 : i32
    %c0_i32_0 = arith.constant 0 : i32
    %c0_i32_1 = arith.constant 0 : i32
    return %c0_i32, %c0_i32_0 : i32, i32
  }
  func.func @transform_2(%arg0: i32, %arg1: i32) -> (i32, i32) {
    %c0_i32 = arith.constant 0 : i32
    %c0_i32_0 = arith.constant 0 : i32
    %c0_i32_1 = arith.constant 0 : i32
    return %c0_i32, %c0_i32_0 : i32, i32
  }
  func.func @transform_3(%arg0: i32, %arg1: i32) -> (i32, i32) {
    %c0_i32 = arith.constant 0 : i32
    %c0_i32_0 = arith.constant 0 : i32
    %c0_i32_1 = arith.constant 0 : i32
    return %c0_i32, %c0_i32_0 : i32, i32
  }
  func.func @transform_4(%arg0: i32, %arg1: i32) -> (i32, i32, i32) {
    %c0_i32 = arith.constant 0 : i32
    %c0_i32_0 = arith.constant 0 : i32
    return %arg0, %arg1, %c0_i32 : i32, i32, i32
  }
  func.func @transform_5(%arg0: i32, %arg1: i32) -> (i32, i32, i32) {
    %c0_i32 = arith.constant 0 : i32
    %c0_i32_0 = arith.constant 0 : i32
    return %arg0, %arg1, %c0_i32 : i32, i32, i32
  }
  func.func @transform_6(%arg0: i32, %arg1: i32) -> (i32, i32, i32) {
    %c0_i32 = arith.constant 0 : i32
    %c0_i32_0 = arith.constant 0 : i32
    return %arg0, %arg1, %c0_i32 : i32, i32, i32
  }
}

</mosaic_0001>

<bundles_post_ra>
// kernel: tpu_custom_call.1
= control target key start
LH: loop header
LB: loop body
LE: loop exit
PB: predicated region body
PF: predicated region fallthrough
CT: control target
= control target key end

     0   :  { %s1282_s0 = inlined_call_operand.vmem [shape: f32[2,8,32], index: 0, kind: input, shape index: {}]   ;;  %s1283_s1 = inlined_call_operand.vmem [shape: f32[32,16], index: 1, kind: input, shape index: {}]   ;;  %s1284_s2 = inlined_call_operand.vmem [shape: f32[32,16], index: 2, kind: input, shape index: {}]   ;;  %s1285_s3 = inlined_call_operand.vmem [shape: f32[32,16], index: 3, kind: input, shape index: {}]   ;;  %s1286_s4 = inlined_call_operand.hbm [shape: f32[2,8,16], index: 4, kind: output, shape index: {0}]   ;;  %s1287_s5 = inlined_call_operand.hbm [shape: f32[2,8,16], index: 5, kind: output, shape index: {1}]   ;;  %s1288_s6 = inlined_call_operand.hbm [shape: f32[2,8,16], index: 6, kind: output, shape index: {2}]  }
   0x1   :  { %1290 = sst [smem:[#allocation9_spill]] %s1282_s0 }
   0x2   :  { %12 = vsyncpa [#allocation3], 0 }
   0x3   :  { %14 = vsyncpa [#allocation3 + $0x1], 0 }
   0x4   :  { %15 = vsyncpa [#allocation5], 0 }
   0x5   :  { %17 = vsyncpa [#allocation5 + $0x1], 0  ;;  %s1047_s21 = smov 0   ;;  %s1049_s22 = smov 0  }
   0x6   :  { %s1051_s23 = smov 0   ;;  %s1053_s24 = smov 0  }
   0x7   :  { %s1055_s25 = smov 0   ;;  %s1057_s26 = smov 0  }
   0x8 LB: > { %s712_s27 = sadd.s32 4294967295, %s1004_s26   ;;  %s1289_s28 = sadd.s32 4294967294, %s1004_s26   ;;  %s1004_s26 = sphi %s1057_s26, %s23_s26   ;;  %s1000_s25 = sphi %s1055_s25, %s1299_s25   ;;  %s996_s24 = sphi %s1053_s24, %s1298_s24   ;;  %s992_s23 = sphi %s1051_s23, %s1297_s23   ;;  %s988_s22 = sphi %s1049_s22, %s1296_s22   ;;  %s984_s21 = sphi %s1047_s21, %s1295_s21  }
   0x9   : > { %s35_s29 = sadd.s32 1, %s1000_s25  ;;  %s135_s30 = sadd.s32 1, %s992_s23 }
   0xa   : > { %p37_p0 = scmp.ge.s32.totalorder %s35_s29, 2  ;;  %p145_p1 = scmp.ne.s32.totalorder %s992_s23, %s988_s22 }
   0xb   : > { %p146_p2 = scmp.eq.s32.totalorder %s712_s27, 1  ;;  %p151_p3 = scmp.ne.s32.totalorder %s988_s22, %s984_s21 }
   0xc   : > { %s1301_s29 = smov (%p37_p0, %s35_s29), 0  ;;  %p152_p5 = scmp.eq.s32.totalorder %s1289_s28, 1 }
   0xd   : > { %p1089_p4 = por %p146_p2, %p145_p1  ;;  %s130_s8 = ssub.s32 %s1000_s25, %s1301_s29 }
   0xe   : > { %p716_p6 = scmp.ge.s32.totalorder %s1004_s26, 1  ;;  %p133_p7 = scmp.eq.s32.totalorder %s130_s8, 0 }
   0xf   : > { %p1098_p8 = por %p152_p5, %p151_p3  ;;  %p245_p9 = scmp.lt.s32.totalorder %s1004_s26, 3 }
  0x10   : > { %s1104_s10 = scalar_select %p133_p7, %s992_s23, %s135_s30  }
  0x11   : > { %p246_p10 = pnand %p716_p6, %p245_p9 }
  0x12   : > { %v295_v0 = vld [vmem:[%s1283_s1] sm:$0xff] (!%p246_p10)  ;;  %v296_v1 = vld [vmem:[%s1283_s1 + $0x8] sm:$0xff] (!%p246_p10)  ;;  %v297_v2 = vld [vmem:[%s1283_s1 + $0x10] sm:$0xff] (!%p246_p10)  ;;  %v1006_v3 = vmov (!%p246_p10), 0.0|0.0   ;;  %p287_p11 = scmp.lt.s32.totalorder (!%p246_p10), %s996_s24, 1  ;;  %vm1007_vm0 = vmmov (!%p246_p10), 0  }
  0x13   : > { %249 = sbr.rel (%p246_p10) target bundleno = 304 (0x130), region = 36  ;;  %780 = vmatprep.subr.bf16.mxu0 (!%p246_p10), %v1006_v3  ;;  %v781_v4 = vpack.c.bf16 (!%p246_p10), %v296_v1, %v295_v0  ;;  %v298_v5 = vld [vmem:[%s1283_s1 + $0x18] sm:$0xff] (!%p246_p10)  ;;  %786 = vmatprep.subr.bf16.mxu1 (!%p246_p10), %v1006_v3  ;;  %v375_v6 = vld [vmem:[%s1284_s2] sm:$0xff] (!%p246_p10)  ;;  %v376_v7 = vld [vmem:[%s1284_s2 + $0x8] sm:$0xff] (!%p246_p10)  ;;  %v1008_v8 = vmov (!%p246_p10), 0.0   ;;  %s1293_s0 = sld [smem:[#allocation9_spill]] (!%p246_p10) }
  0x14   : > { %755 = vmatprep.mubr.msk.f32.mxu0 (!%p246_p10), %vm1007_vm0, %v1008_v8  ;;  %v787_v9 = vpack.c.bf16 (!%p246_p10), %v376_v7, %v375_v6  ;;  %v377_v10 = vld [vmem:[%s1284_s2 + $0x10] sm:$0xff] (!%p246_p10)  ;;  %766 = vmatprep.mubr.msk.f32.mxu1 (!%p246_p10), %vm1007_vm0, %v1008_v8  ;;  %v784_v11 = vpack.c.bf16 (!%p246_p10), %v298_v5, %v297_v2  ;;  %v378_v12 = vld [vmem:[%s1284_s2 + $0x18] sm:$0xff] (!%p246_p10)  ;;  %v450_v13 = vld [vmem:[%s1285_s3] sm:$0xff] (!%p246_p10)  ;;  %vm299_vm1 = vcmask (!%p246_p10), 261120   ;;  %s270_s16 = sand.u32 (!%p246_p10), 1, %s988_s22   ;;  %s1155_s18 = sand.u32 (!%p246_p10), 1, %s712_s27  }
  0x15   : > { %782 = vmatpush3.bf16.msra.mxu0 (!%p246_p10), %v781_v4  ;;  %v451_v14 = vld [vmem:[%s1285_s3 + $0x8] sm:$0xff] (!%p246_p10)  ;;  %v790_v15 = vpack.c.bf16 (!%p246_p10), %v378_v12, %v377_v10  ;;  %v452_v18 = vld [vmem:[%s1285_s3 + $0x10] sm:$0xff] (!%p246_p10)  ;;  %v453_v19 = vld [vmem:[%s1285_s3 + $0x18] sm:$0xff] (!%p246_p10)  ;;  %s1151_s17 = sshll.u32 (!%p246_p10), %s270_s16, 3  ;;  %s1158_s19 = sshll.u32 (!%p246_p10), %s996_s24, 7  ;;  %vm373_vm2 = vcmask (!%p246_p10), 130048  }
  0x16   : > { %783 = vmatprep.subr.bf16.mxu0 (!%p246_p10), %v1006_v3  ;;  %788 = vmatpush3.bf16.msra.mxu1 (!%p246_p10), %v787_v9  ;;  %v793_v17 = vpack.c.bf16 (!%p246_p10), %v451_v14, %v450_v13  ;;  %v796_v20 = vpack.c.bf16 (!%p246_p10), %v453_v19, %v452_v18  ;;  %s279_s8 = scalar_lea.vmem (!%p246_p10), [#allocation4], %s1151_s17  ;;  %s1166_s15 = scalar_lea.hbm (!%p246_p10), %s1286_s4, %s1158_s19 }
  0x17   : > { %789 = vmatprep.subr.bf16.mxu1 (!%p246_p10), %v1006_v3  ;;  %s526_s12 = scalar_lea.sflag (!%p246_p10), [#allocation3], %s270_s16  ;;  %s1009_s28 = smov (!%p246_p10), [#allocation2]  }
  0x19   : > { %785 = vmatpush3.bf16.msra.mxu0 (!%p246_p10), %v784_v11 }
  0x1a   : > { %s288_s13 = scalar_select %p287_p11, %s996_s24, 1  ;;  %792 = vmatprep.subr.bf16.mxu0 %v1006_v3  ;;  %791 = vmatpush3.bf16.msra.mxu1 %v790_v15 }
  0x1b   : > { %s870_s24 = sshll.u32 %s1009_s28, 4  ;;  %s871_s24 = int_to_ptr.vmem [resolvable:$false] %s870_s24 }
  0x1c   : > { %s720_s20 = sshll.u32 %s288_s13, 3  ;;  %s1174_s13 = scalar_lea.hbm %s1287_s5, %s1158_s19 }
  0x1d   : > { %s293_s11 = scalar_lea.vmem %s1293_s0, %s720_s20  ;;  %s272_s20 = scalar_lea.vmem [#allocation2], %s1151_s17 }
  0x1e   : > { %v294_v16 = vld [vmem:[%s293_s11] sm:$0xff]  ;;  %s550_s30 = sshll.u32 %s272_s20, 4  ;;  %s564_s11 = sshll.u32 %s279_s8, 4  ;;  %s1168_s30 = int_to_ptr.vmem [resolvable:$true] %s550_s30  ;;  %s1176_s11 = int_to_ptr.vmem [resolvable:$true] %s564_s11 }
  0x1f   : > { %756 = vmatmul.mubr.msk.f32.vlgmr.msra.gmra.mrb[0].mxu0 %vm299_vm1, %v294_v16  ;;  %767 = vmatmul.mubr.msk.f32.vlgmr.msra.gmra.mrb[0].mxu1 %vm299_vm1, %v294_v16  ;;  %s866_s14 = scalar_lea.vmem %s1168_s30, 128  ;;  %s872_s27 = scalar_lea.vmem %s871_s24, 256 }
  0x20   : > { %794 = vmatpush3.bf16.msra.mxu0 %v793_v17  ;;  %777 = vmatprep.mubr.msk.f32.mxu0 %vm1007_vm0, %v1008_v8  ;;  %p867_p12 = scmp.ne.s32.totalorder %s1168_s30, %s866_s14  ;;  %p873_p1 = scmp.lt.s32.totalorder %s1168_s30, %s871_s24 }
  0x21   : > { %795 = vmatprep.subr.bf16.mxu0 %v1006_v3  ;;  %p874_p2 = scmp.lt.s32.totalorder %s872_s27, %s866_s14 }
  0x22   : > { %p868_p13 = pnand %p867_p12, %p1089_p4 }
  0x23   : > { %p875_p3 = por %p874_p2, %p873_p1 }
  0x24   : > { %797 = vmatpush3.bf16.msra.mxu0 %v796_v20  ;;  %p869_p0 = pneg %p868_p13 }
  0x26   : > { %p876_p5 = pnand %p875_p3, %p869_p0 }
  0x27   : > { %778 = vmatmul.mubr.msk.f32.vlgmr.msra.gmra.mrb[2].mxu0 %vm299_vm1, %v294_v16 }
  0xf2   : > { %v369_v21 = vpop.f32.mrb[0].mxu0  ;;  %v445_v23 = vpop.f32.mrb[0].mxu1 }
  0xf3   : > { %374 = vst.msk [vmem:[%s272_s20] sm:$0xff] %vm373_vm2, %v369_v21  ;;  %v757_v22 = vpop.f32.mrb[1].mxu0  ;;  %449 = vst.msk [vmem:[%s279_s8] sm:$0xff] %vm373_vm2, %v445_v23  ;;  %v768_v24 = vpop.f32.mrb[1].mxu1 }
  0xf4   : > { %879 = shalt.err (!%p876_p5)
}
  0xf5   : > { %s880_s16 = scalar_lea.hbm %s1166_s15, 128  ;;  %s884_s28 = scalar_lea.hbm %s1286_s4, 256 }
  0xf6   : > { %p881_p6 = scmp.ne.s32.totalorder %s1166_s15, %s880_s16  ;;  %p885_p10 = scmp.lt.u32.totalorder %s1166_s15, %s1286_s4 }
  0xf7   : > { %p886_p11 = scmp.lt.u32.totalorder %s884_s28, %s880_s16  ;;  %p888_p13 = scmp.lt.u32.totalorder %s880_s16, %s1166_s15 }
  0xf8   : > { %p882_p7 = pnand %p881_p6, %p1089_p4 }
  0xf9   : > { %p887_p12 = por %p886_p11, %p885_p10 }
  0xfa   : > { %p883_p9 = pneg %p882_p7 }
  0xfb   : > { %p889_p0 = por %p888_p13, %p887_p12 }
  0xfd   : > { %p890_p1 = pnand %p889_p0, %p883_p9 }
  0xff   : > { %893 = shalt.err (!%p890_p1)
}
 0x100   : > { %798 = dma.vmem_to_hbm [thread:$0]  (%p1089_p4), %s1168_s30, 128, %s1166_s15, %s526_s12  }
 0x101   : > { %s531_s14 = scalar_lea.sflag [#allocation5], %s1155_s18  ;;  %s894_s27 = scalar_lea.vmem %s1176_s11, 128 }
 0x102   : > { %p895_p2 = scmp.ne.s32.totalorder %s1176_s11, %s894_s27  ;;  %s1010_s0 = smov [#allocation4]  }
 0x103   : > { %s898_s16 = sshll.u32 %s1010_s0, 4  ;;  %s899_s16 = int_to_ptr.vmem [resolvable:$false] %s898_s16 }
 0x104   : > { %p896_p3 = pnand %p895_p2, %p1089_p4  ;;  %s900_s20 = scalar_lea.vmem %s899_s16, 256 }
 0x105   : > { %p901_p6 = scmp.lt.s32.totalorder %s1176_s11, %s899_s16  ;;  %p902_p7 = scmp.lt.s32.totalorder %s900_s20, %s894_s27 }
 0x106   : > { %p897_p5 = pneg %p896_p3 }
 0x107   : > { %p903_p9 = por %p902_p7, %p901_p6 }
 0x109   : > { %p904_p10 = pnand %p903_p9, %p897_p5 }
 0x10b   : > { %907 = shalt.err (!%p904_p10)
}
 0x10c   : > { %s908_s30 = scalar_lea.hbm %s1174_s13, 128  ;;  %s912_s8 = scalar_lea.hbm %s1287_s5, 256 }
 0x10d   : > { %p909_p11 = scmp.ne.s32.totalorder %s1174_s13, %s908_s30  ;;  %p913_p0 = scmp.lt.u32.totalorder %s1174_s13, %s1287_s5 }
 0x10e   : > { %p914_p1 = scmp.lt.u32.totalorder %s912_s8, %s908_s30  ;;  %p916_p3 = scmp.lt.u32.totalorder %s908_s30, %s1174_s13 }
 0x10f   : > { %p910_p12 = pnand %p909_p11, %p1089_p4 }
 0x110   : > { %p915_p2 = por %p914_p1, %p913_p0 }
 0x111   : > { %p911_p13 = pneg %p910_p12 }
 0x112   : > { %p917_p5 = por %p916_p3, %p915_p2 }
 0x114   : > { %p918_p6 = pnand %p917_p5, %p911_p13 }
 0x116   : > { %921 = shalt.err (!%p918_p6)
}
 0x117   : > { %799 = dma.vmem_to_hbm [thread:$0]  (%p1089_p4), %s1176_s11, 128, %s1174_s13, %s531_s14   ;;  %v520_v25 = vpop.f32.mrb[2].mxu0 }
 0x118   : > { %s286_s27 = scalar_lea.vmem [#allocation6], %s1151_s17  ;;  %s1232_s30 = scalar_lea.hbm %s1288_s6, %s1158_s19  ;;  %v779_v26 = vpop.f32.mrb[3].mxu0 }
 0x119   : > { %s578_s0 = sshll.u32 %s286_s27, 4  ;;  %524 = vst.msk [vmem:[%s286_s27] sm:$0xff] %vm373_vm2, %v520_v25  ;;  %s1011_s17 = smov [#allocation6]   ;;  %s1226_s0 = int_to_ptr.vmem [resolvable:$true] %s578_s0 }
 0x11a   : > { %s922_s15 = scalar_lea.vmem %s1226_s0, 128  ;;  %s926_s11 = sshll.u32 %s1011_s17, 4  ;;  %s927_s11 = int_to_ptr.vmem [resolvable:$false] %s926_s11 }
 0x11b   : > { %p923_p7 = scmp.ne.s32.totalorder %s1226_s0, %s922_s15  ;;  %s928_s13 = scalar_lea.vmem %s927_s11, 256 }
 0x11c   : > { %p929_p11 = scmp.lt.s32.totalorder %s1226_s0, %s927_s11  ;;  %p930_p12 = scmp.lt.s32.totalorder %s928_s13, %s922_s15 }
 0x11d   : > { %p924_p9 = pnand %p923_p7, %p1089_p4 }
 0x11e   : > { %p931_p13 = por %p930_p12, %p929_p11 }
 0x11f   : > { %p925_p10 = pneg %p924_p9 }
 0x121   : > { %p932_p0 = pnand %p931_p13, %p925_p10 }
 0x123   : > { %935 = shalt.err (!%p932_p0)
}
 0x124   : > { %s936_s19 = scalar_lea.hbm %s1232_s30, 128  ;;  %s940_s28 = scalar_lea.hbm %s1288_s6, 256 }
 0x125   : > { %p937_p1 = scmp.ne.s32.totalorder %s1232_s30, %s936_s19  ;;  %p941_p5 = scmp.lt.u32.totalorder %s1232_s30, %s1288_s6 }
 0x126   : > { %p942_p6 = scmp.lt.u32.totalorder %s940_s28, %s936_s19  ;;  %p944_p9 = scmp.lt.u32.totalorder %s936_s19, %s1232_s30 }
 0x127   : > { %p938_p2 = pnand %p937_p1, %p1089_p4 }
 0x128   : > { %p943_p7 = por %p942_p6, %p941_p5 }
 0x129   : > { %p939_p3 = pneg %p938_p2 }
 0x12a   : > { %p945_p10 = por %p944_p9, %p943_p7 }
 0x12c   : > { %p946_p11 = pnand %p945_p10, %p939_p3 }
 0x12e   : > { %949 = shalt.err (!%p946_p11)
}
 0x12f   : > { %800 = dma.vmem_to_hbm [thread:$0]  (%p1089_p4), %s1226_s0, 128, %s1232_s30, %s531_s14  }
 0x130 PF: > { %p814_p12 = scmp.ge.s32.totalorder %s1004_s26, 2  ;;  %s590_s16 = sand.u32 1, %s984_s21  }
 0x131   : > { %s591_s20 = scalar_lea.sflag [#allocation3], %s590_s16 }
 0x132   : > { %p805_p13 = pnand %p814_p12, %p1098_p8 }
 0x134   : > { %975 = dma.done.wait (!%p805_p13), %s591_s20, 128  }
 0x135   : > { %977 = vsyncadd (!%p805_p13), %s591_s20, 4294967168  ;;  %s1294_s15 = sadd.s32 4294967294, %s1004_s26  }
 0x136   : > { %s599_s17 = sand.u32 1, %s1294_s15  }
 0x137   : > { %s600_s7 = scalar_lea.sflag [#allocation5], %s599_s17 }
 0x138   : > { %979 = dma.done.wait (!%p805_p13), %s600_s7, 256  }
 0x139   : > { %981 = vsyncadd (!%p805_p13), %s600_s7, 4294967040  ;;  %s23_s26 = sadd.s32 1, %s1004_s26   ;;  %s1295_s21 = smov %s988_s22 }
 0x13a   : > { %p20_p4 = scmp.ge.s32.totalorder %s23_s26, 4   ;;  %s1296_s22 = smov %s992_s23 }
 0x13b   : > { %s1297_s23 = smov %s1104_s10  ;;  %s1298_s24 = smov %s1000_s25 }
 0x13c   : > { %s1299_s25 = smov %s1301_s29  ;;  %22 = sbr.rel (!%p20_p4) target bundleno = 8 (0x8), region = 103 }
 0x143   :  { %614 = vsyncpa [#allocation3], 1 }
 0x144   :  { %616 = vsyncpa [#allocation3 + $0x1], 1 }
 0x145   :  { %617 = vsyncpa [#allocation5], 1 }
 0x146   :  { %619 = vsyncpa [#allocation5 + $0x1], 1 }

</bundles_post_ra>
